<compile_context>
chip_gen: v7x
topology: tpu7x:2x2x1
jax: 0.10.0
libtpu: 0.0.40
codegen_flags: <defaults>
</compile_context>

<pallas_src>
import jax
import jax.numpy as jnp
from jax.experimental import pallas as pl
from jax.experimental.pallas import tpu as pltpu


def _gelu_exact(x):
    # PyTorch nn.GELU() default = exact (erf) GELU, computed in f32.
    return 0.5 * x * (1.0 + jax.lax.erf(x * 0.7071067811865476))


def _round_up(v, m):
    return (v + m - 1) // m * m


def _make_mlp_kernel(d_out_real, d_out_pad):
    need_mask = d_out_real != d_out_pad
    inv_n = 1.0 / float(d_out_real)

    def kernel(x_ref, w1_ref, b1_ref, w2_ref, b2_ref, g_ref, beta_ref,
               o_ref, acc_ref):
        k = pl.program_id(1)

        @pl.when(k == 0)
        def _():
            acc_ref[...] = jnp.zeros_like(acc_ref)

        # fc1 chunk: native-dtype operands, f32 accumulation on the MXU.
        h = jnp.dot(x_ref[...], w1_ref[...],
                    preferred_element_type=jnp.float32)
        h = _gelu_exact(h + b1_ref[...])          # b1 is already f32
        # dropout (p=0.0) is identity.

        # fc2 chunk, accumulated into resident f32 VMEM scratch.
        acc_ref[...] += jnp.dot(h.astype(w2_ref.dtype), w2_ref[...],
                                preferred_element_type=jnp.float32)

        @pl.when(k == pl.num_programs(1) - 1)
        def _():
            y = acc_ref[...] + b2_ref[...]
            if need_mask:
                lane = jax.lax.broadcasted_iota(jnp.int32, y.shape, 1)
                mask = lane < d_out_real
                y_m = jnp.where(mask, y, 0.0)
                mean = jnp.sum(y_m, axis=-1, keepdims=True) * inv_n
                diff = jnp.where(mask, y - mean, 0.0)
                var = jnp.sum(diff * diff, axis=-1, keepdims=True) * inv_n
            else:
                mean = jnp.mean(y, axis=-1, keepdims=True)
                var = jnp.mean((y - mean) ** 2, axis=-1, keepdims=True)
            y_hat = (y - mean) * jax.lax.rsqrt(var + 1e-6)
            out = y_hat * g_ref[...] + beta_ref[...]
            o_ref[...] = out.astype(o_ref.dtype)

    return kernel


def mlp_pallas(x, w1, b1, w2, b2, gamma, beta, *, tm=256, th=512):
    """x: (M, D_in); weights stored transposed as (in, out). Returns (M, D_out)."""
    M, D_in = x.shape
    H = w1.shape[1]
    D_out = w2.shape[1]
    dtype = x.dtype
    itm = dtype.itemsize

    # Row tile: multiple of 16 (bf16 sublane packing), capped by padded M.
    tm_eff = min(tm, _round_up(M, 16))
    M_pad = _round_up(M, tm_eff)

    # Lane-dense feature dims (multiples of 128).
    D_in_p = _round_up(D_in, 128)
    D_out_p = _round_up(D_out, 128)
    th_eff = min(th, _round_up(H, 128))
    H_pad = _round_up(H, th_eff)

    # Zero-pad; padded hidden columns contribute exactly 0 (gelu(0)=0, w2 rows 0),
    # padded output columns are sliced off, padded rows are sliced off.
    xp = jnp.pad(x, ((0, M_pad - M), (0, D_in_p - D_in)))
    w1p = jnp.pad(w1, ((0, D_in_p - D_in), (0, H_pad - H)))
    w2p = jnp.pad(w2, ((0, H_pad - H), (0, D_out_p - D_out)))
    b1p = jnp.pad(b1, (0, H_pad - H)).astype(jnp.float32).reshape(1, H_pad)
    b2p = jnp.pad(b2, (0, D_out_p - D_out)).astype(jnp.float32).reshape(1, D_out_p)
    gp = jnp.pad(gamma, (0, D_out_p - D_out)).astype(jnp.float32).reshape(1, D_out_p)
    bep = jnp.pad(beta, (0, D_out_p - D_out)).astype(jnp.float32).reshape(1, D_out_p)

    grid = (M_pad // tm_eff, H_pad // th_eff)

    # VMEM budget: double-buffered x/out tiles + double-buffered weight slabs
    # + f32 accumulator + small params, with 2x headroom, clamped to 64 MiB
    # (safe on v7x, generous on v5e/v6e).
    vmem_need = (2 * tm_eff * D_in_p * itm
                 + 2 * tm_eff * D_out_p * itm
                 + 2 * (D_in_p * th_eff + th_eff * D_out_p) * itm
                 + tm_eff * D_out_p * 4
                 + 2 * (th_eff + 3 * D_out_p) * 4)
    vmem_limit = int(min(max(2 * vmem_need, 32 * 1024 * 1024), 64 * 1024 * 1024))

    cost = pl.CostEstimate(
        flops=2 * M * (D_in * H + H * D_out),
        transcendentals=M * H,
        bytes_accessed=(x.size * itm + w1.size * w1.dtype.itemsize
                        + w2.size * w2.dtype.itemsize + M * D_out * itm),
    )

    kernel = _make_mlp_kernel(D_out, D_out_p)

    out_pad = pl.pallas_call(
        kernel,
        out_shape=jax.ShapeDtypeStruct((M_pad, D_out_p), dtype),
        grid_spec=pltpu.PrefetchScalarGridSpec(
            num_scalar_prefetch=0,
            grid=grid,
            in_specs=[
                pl.BlockSpec((tm_eff, D_in_p), lambda i, k: (i, 0)),   # x
                pl.BlockSpec((D_in_p, th_eff), lambda i, k: (0, k)),   # w1 slab
                pl.BlockSpec((1, th_eff), lambda i, k: (0, k)),        # b1 slab
                pl.BlockSpec((th_eff, D_out_p), lambda i, k: (k, 0)),  # w2 slab
                pl.BlockSpec((1, D_out_p), lambda i, k: (0, 0)),       # b2
                pl.BlockSpec((1, D_out_p), lambda i, k: (0, 0)),       # gamma
                pl.BlockSpec((1, D_out_p), lambda i, k: (0, 0)),       # beta
            ],
            out_specs=pl.BlockSpec((tm_eff, D_out_p), lambda i, k: (i, 0)),
            scratch_shapes=[pltpu.VMEM((tm_eff, D_out_p), jnp.float32)],
        ),
        compiler_params=pltpu.CompilerParams(
            dimension_semantics=("parallel", "arbitrary"),
            vmem_limit_bytes=vmem_limit),
        cost_estimate=cost,
    )(xp, w1p, b1p, w2p, b2p, gp, bep)

    return out_pad[:M, :D_out]


def mlp_reference(x, w1, b1, w2, b2, gamma, beta):
    h = x @ w1 + b1
    h = 0.5 * h * (1.0 + jax.lax.erf(h / jnp.sqrt(2.0)))
    y = h @ w2 + b2
    mean = jnp.mean(y, axis=-1, keepdims=True)
    var = jnp.mean((y - mean) ** 2, axis=-1, keepdims=True)
    return (y - mean) / jnp.sqrt(var + 1e-6) * gamma + beta


if __name__ == "__main__":
    key = jax.random.PRNGKey(0)

    # Small shapes consistent with the module's forward:
    # tokens = batch * seq = 2 * 8 = 16, in_features=32, hidden=64, out=32.
    B, S = 2, 8
    D_in, H, D_out = 32, 64, 32

    k = jax.random.split(key, 8)
    x = jax.random.normal(k[0], (B, S, D_in), dtype=jnp.float32)
    # PyTorch Linear weight shape is (out, in); stored transposed as (in, out).
    w1 = jax.random.normal(k[1], (D_in, H), dtype=jnp.float32) * 0.05
    b1 = jax.random.normal(k[2], (H,), dtype=jnp.float32) * 0.01
    w2 = jax.random.normal(k[3], (H, D_out), dtype=jnp.float32) * 0.05
    b2 = jax.random.normal(k[4], (D_out,), dtype=jnp.float32) * 0.01
    gamma = jnp.ones((D_out,), dtype=jnp.float32)
    beta = jnp.zeros((D_out,), dtype=jnp.float32)

    x2d = x.reshape(B * S, D_in)
    out = mlp_pallas(x2d, w1, b1, w2, b2, gamma, beta)
    out = jax.block_until_ready(out).reshape(B, S, D_out)

    ref = mlp_reference(x2d, w1, b1, w2, b2, gamma, beta).reshape(B, S, D_out)
    assert out.shape == (B, S, D_out)
    assert jnp.allclose(out, ref, atol=1e-4, rtol=1e-4), "mismatch vs reference"

    print("KERNEL_OK")
</pallas_src>

<mosaic_0001>
module attributes {stable_mosaic.version = 11 : i64} {
  func.func @kernel(%arg0: i32, %arg1: i32, %arg2: memref<16x128xf32, #tpu.memory_space<vmem>>, %arg3: memref<128x128xf32, #tpu.memory_space<vmem>>, %arg4: memref<1x128xf32, #tpu.memory_space<vmem>>, %arg5: memref<128x128xf32, #tpu.memory_space<vmem>>, %arg6: memref<1x128xf32, #tpu.memory_space<vmem>>, %arg7: memref<1x128xf32, #tpu.memory_space<vmem>>, %arg8: memref<1x128xf32, #tpu.memory_space<vmem>>, %arg9: memref<16x128xf32, #tpu.memory_space<vmem>>, %arg10: memref<16x128xf32, #tpu.memory_space<vmem>>) attributes {dimension_semantics = [#tpu.dimension_semantics<parallel>, #tpu.dimension_semantics<arbitrary>], iteration_bounds = array<i64: 1, 1>, scalar_prefetch = 0 : i64, scratch_operands = 1 : i64, tpu.core_type = #tpu.core_type<tc>, window_params = [{transform_indices = @transform_0, window_bounds = array<i64: 16, 128>}, {transform_indices = @transform_1, window_bounds = array<i64: 128, 128>}, {transform_indices = @transform_2, window_bounds = array<i64: 1, 128>}, {transform_indices = @transform_3, window_bounds = array<i64: 128, 128>}, {pipeline_mode = #tpu.pipeline_mode<synchronous>, transform_indices = @transform_4, window_bounds = array<i64: 1, 128>}, {pipeline_mode = #tpu.pipeline_mode<synchronous>, transform_indices = @transform_5, window_bounds = array<i64: 1, 128>}, {pipeline_mode = #tpu.pipeline_mode<synchronous>, transform_indices = @transform_6, window_bounds = array<i64: 1, 128>}, {transform_indices = @transform_7, window_bounds = array<i64: 16, 128>}]} {
    %c0_i32 = arith.constant 0 : i32
    %0 = arith.cmpi eq, %arg1, %c0_i32 : i32
    %1 = arith.extui %0 : i1 to i32
    %c0_i32_0 = arith.constant 0 : i32
    %2 = arith.cmpi ne, %1, %c0_i32_0 : i32
    scf.if %2 {
      %cst_18 = arith.constant 0.000000e+00 : f32
      %25 = vector.broadcast %cst_18 : f32 to vector<16x128xf32>
      %c0_19 = arith.constant 0 : index
      %c0_20 = arith.constant 0 : index
      %26 = vector.load %arg10[%c0_19, %c0_20] : memref<16x128xf32, #tpu.memory_space<vmem>>, vector<16x128xf32>
      tpu.vector_store %arg10[%c0_19, %c0_20], %25 {strides = array<i32>} : memref<16x128xf32, #tpu.memory_space<vmem>>, vector<16x128xf32>,
    } else {
    }
    %c0 = arith.constant 0 : index
    %c0_1 = arith.constant 0 : index
    %3 = vector.load %arg2[%c0, %c0_1] : memref<16x128xf32, #tpu.memory_space<vmem>>, vector<16x128xf32>
    %c0_2 = arith.constant 0 : index
    %c0_3 = arith.constant 0 : index
    %4 = vector.load %arg3[%c0_2, %c0_3] : memref<128x128xf32, #tpu.memory_space<vmem>>, vector<128x128xf32>
    %cst = arith.constant dense<0.000000e+00> : vector<16x128xf32>
    %5 = tpu.matmul %3, %4, %cst {dimension_numbers = #tpu.dot_dimension_numbers<[1], [0], [0], [1], [0, 0, 1, 1], [], []>} : vector<16x128xf32>, vector<128x128xf32>, vector<16x128xf32> -> vector<16x128xf32>
    %c0_4 = arith.constant 0 : index
    %c0_5 = arith.constant 0 : index
    %6 = vector.load %arg4[%c0_4, %c0_5] : memref<1x128xf32, #tpu.memory_space<vmem>>, vector<1x128xf32>
    %7 = vector.broadcast %6 : vector<1x128xf32> to vector<16x128xf32>
    %8 = arith.addf %5, %7 : vector<16x128xf32>
    %cst_6 = arith.constant 5.000000e-01 : f32
    %9 = vector.broadcast %cst_6 : f32 to vector<16x128xf32>
    %10 = arith.mulf %9, %8 : vector<16x128xf32>
    %cst_7 = arith.constant 0.707106769 : f32
    %11 = vector.broadcast %cst_7 : f32 to vector<16x128xf32>
    %12 = arith.mulf %8, %11 : vector<16x128xf32>
    %13 = math.erf %12 : vector<16x128xf32>
    %cst_8 = arith.constant 1.000000e+00 : f32
    %14 = vector.broadcast %cst_8 : f32 to vector<16x128xf32>
    %15 = arith.addf %14, %13 : vector<16x128xf32>
    %16 = arith.mulf %10, %15 : vector<16x128xf32>
    %c0_9 = arith.constant 0 : index
    %c0_10 = arith.constant 0 : index
    %17 = vector.load %arg10[%c0_9, %c0_10] : memref<16x128xf32, #tpu.memory_space<vmem>>, vector<16x128xf32>
    %c0_11 = arith.constant 0 : index
    %c0_12 = arith.constant 0 : index
    %18 = vector.load %arg5[%c0_11, %c0_12] : memref<128x128xf32, #tpu.memory_space<vmem>>, vector<128x128xf32>
    %cst_13 = arith.constant dense<0.000000e+00> : vector<16x128xf32>
    %19 = tpu.matmul %16, %18, %cst_13 {dimension_numbers = #tpu.dot_dimension_numbers<[1], [0], [0], [1], [0, 0, 1, 1], [], []>} : vector<16x128xf32>, vector<128x128xf32>, vector<16x128xf32> -> vector<16x128xf32>
    %20 = arith.addf %17, %19 : vector<16x128xf32>
    %c0_14 = arith.constant 0 : index
    %c0_15 = arith.constant 0 : index
    %21 = vector.load %arg10[%c0_14, %c0_15] : memref<16x128xf32, #tpu.memory_space<vmem>>, vector<16x128xf32>
    tpu.vector_store %arg10[%c0_14, %c0_15], %20 {strides = array<i32>} : memref<16x128xf32, #tpu.memory_space<vmem>>, vector<16x128xf32>,
    %c0_i32_16 = arith.constant 0 : i32
    %22 = arith.cmpi eq, %arg1, %c0_i32_16 : i32
    %23 = arith.extui %22 : i1 to i32
    %c0_i32_17 = arith.constant 0 : i32
    %24 = arith.cmpi ne, %23, %c0_i32_17 : i32
    scf.if %24 {
      %c0_18 = arith.constant 0 : index
      %c0_19 = arith.constant 0 : index
      %25 = vector.load %arg10[%c0_18, %c0_19] : memref<16x128xf32, #tpu.memory_space<vmem>>, vector<16x128xf32>
      %c0_20 = arith.constant 0 : index
      %c0_21 = arith.constant 0 : index
      %26 = vector.load %arg6[%c0_20, %c0_21] : memref<1x128xf32, #tpu.memory_space<vmem>>, vector<1x128xf32>
      %27 = vector.broadcast %26 : vector<1x128xf32> to vector<16x128xf32>
      %28 = arith.addf %25, %27 : vector<16x128xf32>
      %29 = tpu.iota {dimensions = array<i32: 1>} : vector<16x128xi32>
      %c32_i32 = arith.constant 32 : i32
      %30 = vector.broadcast %c32_i32 : i32 to vector<16x128xi32>
      %31 = arith.cmpi slt, %29, %30 : vector<16x128xi32>
      %cst_22 = arith.constant 0.000000e+00 : f32
      %32 = vector.broadcast %cst_22 : f32 to vector<16x128xf32>
      %33 = arith.select %31, %28, %32 : vector<16x128xi1>, vector<16x128xf32>
      %cst_23 = arith.constant dense<0.000000e+00> : vector<16xf32>
      %34 = vector.multi_reduction <add>, %33, %cst_23 [1] : vector<16x128xf32> to vector<16xf32>
      %35 = vector.shape_cast %34 : vector<16xf32> to vector<16x1xf32>
      %cst_24 = arith.constant 3.125000e-02 : f32
      %36 = vector.broadcast %cst_24 : f32 to vector<16x1xf32>
      %37 = arith.mulf %35, %36 : vector<16x1xf32>
      %38 = vector.broadcast %37 : vector<16x1xf32> to vector<16x128xf32>
      %39 = arith.subf %28, %38 : vector<16x128xf32>
      %cst_25 = arith.constant 0.000000e+00 : f32
      %40 = vector.broadcast %cst_25 : f32 to vector<16x128xf32>
      %41 = arith.select %31, %39, %40 : vector<16x128xi1>, vector<16x128xf32>
      %42 = arith.mulf %41, %41 : vector<16x128xf32>
      %cst_26 = arith.constant dense<0.000000e+00> : vector<16xf32>
      %43 = vector.multi_reduction <add>, %42, %cst_26 [1] : vector<16x128xf32> to vector<16xf32>
      %44 = vector.shape_cast %43 : vector<16xf32> to vector<16x1xf32>
      %cst_27 = arith.constant 3.125000e-02 : f32
      %45 = vector.broadcast %cst_27 : f32 to vector<16x1xf32>
      %46 = arith.mulf %44, %45 : vector<16x1xf32>
      %47 = vector.broadcast %37 : vector<16x1xf32> to vector<16x128xf32>
      %48 = arith.subf %28, %47 : vector<16x128xf32>
      %cst_28 = arith.constant 9.99999997E-7 : f32
      %49 = vector.broadcast %cst_28 : f32 to vector<16x1xf32>
      %50 = arith.addf %46, %49 : vector<16x1xf32>
      %51 = math.rsqrt %50 : vector<16x1xf32>
      %52 = vector.broadcast %51 : vector<16x1xf32> to vector<16x128xf32>
      %53 = arith.mulf %48, %52 : vector<16x128xf32>
      %c0_29 = arith.constant 0 : index
      %c0_30 = arith.constant 0 : index
      %54 = vector.load %arg7[%c0_29, %c0_30] : memref<1x128xf32, #tpu.memory_space<vmem>>, vector<1x128xf32>
      %55 = vector.broadcast %54 : vector<1x128xf32> to vector<16x128xf32>
      %56 = arith.mulf %53, %55 : vector<16x128xf32>
      %c0_31 = arith.constant 0 : index
      %c0_32 = arith.constant 0 : index
      %57 = vector.load %arg8[%c0_31, %c0_32] : memref<1x128xf32, #tpu.memory_space<vmem>>, vector<1x128xf32>
      %58 = vector.broadcast %57 : vector<1x128xf32> to vector<16x128xf32>
      %59 = arith.addf %56, %58 : vector<16x128xf32>
      %c0_33 = arith.constant 0 : index
      %c0_34 = arith.constant 0 : index
      %60 = vector.load %arg9[%c0_33, %c0_34] : memref<16x128xf32, #tpu.memory_space<vmem>>, vector<16x128xf32>
      tpu.vector_store %arg9[%c0_33, %c0_34], %59 {strides = array<i32>} : memref<16x128xf32, #tpu.memory_space<vmem>>, vector<16x128xf32>,
    } else {
    }
    return
  }
  func.func @transform_0(%arg0: i32, %arg1: i32) -> (i32, i32) {
    %c0_i32 = arith.constant 0 : i32
    %c0_i32_0 = arith.constant 0 : i32
    return %arg0, %c0_i32 : i32, i32
  }
  func.func @transform_1(%arg0: i32, %arg1: i32) -> (i32, i32) {
    %c0_i32 = arith.constant 0 : i32
    %c0_i32_0 = arith.constant 0 : i32
    return %c0_i32, %arg1 : i32, i32
  }
  func.func @transform_2(%arg0: i32, %arg1: i32) -> (i32, i32) {
    %c0_i32 = arith.constant 0 : i32
    %c0_i32_0 = arith.constant 0 : i32
    return %c0_i32, %arg1 : i32, i32
  }
  func.func @transform_3(%arg0: i32, %arg1: i32) -> (i32, i32) {
    %c0_i32 = arith.constant 0 : i32
    %c0_i32_0 = arith.constant 0 : i32
    return %arg1, %c0_i32 : i32, i32
  }
  func.func @transform_4(%arg0: i32, %arg1: i32) -> (i32, i32) {
    %c0_i32 = arith.constant 0 : i32
    %c0_i32_0 = arith.constant 0 : i32
    %c0_i32_1 = arith.constant 0 : i32
    return %c0_i32, %c0_i32_0 : i32, i32
  }
  func.func @transform_5(%arg0: i32, %arg1: i32) -> (i32, i32) {
    %c0_i32 = arith.constant 0 : i32
    %c0_i32_0 = arith.constant 0 : i32
    %c0_i32_1 = arith.constant 0 : i32
    return %c0_i32, %c0_i32_0 : i32, i32
  }
  func.func @transform_6(%arg0: i32, %arg1: i32) -> (i32, i32) {
    %c0_i32 = arith.constant 0 : i32
    %c0_i32_0 = arith.constant 0 : i32
    %c0_i32_1 = arith.constant 0 : i32
    return %c0_i32, %c0_i32_0 : i32, i32
  }
  func.func @transform_7(%arg0: i32, %arg1: i32) -> (i32, i32) {
    %c0_i32 = arith.constant 0 : i32
    %c0_i32_0 = arith.constant 0 : i32
    return %arg0, %c0_i32 : i32, i32
  }
}

</mosaic_0001>

<bundles_post_ra>
// kernel: tpu_custom_call.1
= control target key start
LH: loop header
LB: loop body
LE: loop exit
PB: predicated region body
PF: predicated region fallthrough
CT: control target
= control target key end

     0   :  { %12 = vsyncpa [#allocation4], 0  ;;  %s773_s0 = inlined_call_operand.hbm [shape: f32[16,128], index: 0, kind: input, shape index: {}]   ;;  %s774_s1 = inlined_call_operand.hbm [shape: f32[128,128], index: 1, kind: input, shape index: {}]   ;;  %s775_s2 = inlined_call_operand.vmem [shape: f32[1,128], index: 2, kind: input, shape index: {}]   ;;  %s776_s3 = inlined_call_operand.hbm [shape: f32[128,128], index: 3, kind: input, shape index: {}]   ;;  %s777_s4 = inlined_call_operand.vmem [shape: f32[1,128], index: 4, kind: input, shape index: {}]   ;;  %s778_s5 = inlined_call_operand.vmem [shape: f32[1,128], index: 5, kind: input, shape index: {}]   ;;  %s779_s6 = inlined_call_operand.vmem [shape: f32[1,128], index: 6, kind: input, shape index: {}]   ;;  %s780_s7 = inlined_call_operand.hbm [shape: f32[16,128], index: 7, kind: output, shape index: {}]  }
   0x1   :  { %13 = vsyncpa [#allocation7], 0 }
   0x2   :  { %14 = vsyncpa [#allocation5], 0  ;;  %s644_s24 = smov [#allocation6]   ;;  %s645_s26 = smov [#allocation3]  }
   0x3   :  { %s32_s25 = sshll.u32 %s644_s24, 4  ;;  %s20_s27 = sshll.u32 %s645_s26, 4  ;;  %s33_s25 = int_to_ptr.vmem [resolvable:$true] %s32_s25  ;;  %s690_s27 = int_to_ptr.vmem [resolvable:$true] %s20_s27 }
   0x4   :  { %s550_s30 = scalar_lea.hbm %s774_s1, 2048 }
   0x5   :  { %p551_p0 = scmp.ne.s32.totalorder %s774_s1, %s550_s30  ;;  %p554_p1 = scmp.lt.u32.totalorder %s550_s30, %s774_s1 }
   0x7   :  { %p556_p2 = pnand %p554_p1, %p551_p0 }
   0x9   :  { %559 = shalt.err (!%p556_p2)
}
   0xa   :  { %s560_s12 = scalar_lea.vmem %s33_s25, 2048  ;;  %p565_p4 = scmp.lt.s32.totalorder %s33_s25, %s33_s25 }
   0xb   :  { %p561_p3 = scmp.ne.s32.totalorder %s33_s25, %s560_s12  ;;  %p566_p5 = scmp.lt.s32.totalorder %s560_s12, %s560_s12 }
   0xd   :  { %p567_p6 = por %p566_p5, %p565_p4 }
   0xf   :  { %p568_p7 = pnand %p567_p6, %p561_p3 }
  0x11   :  { %571 = shalt.err (!%p568_p7)
}
  0x12   :  { %s646_s13 = smov 128   ;;  %s647_s14 = smov 8  }
  0x13   :  { %38 = dma.hbm_to_vmem [thread:$0]  %s774_s1, 2048, %s33_s25, [#allocation7], %s646_s13, %s646_s13, %s647_s14  }
  0x14   :  { %s572_s19 = scalar_lea.hbm %s773_s0, 256 }
  0x15   :  { %p573_p8 = scmp.ne.s32.totalorder %s773_s0, %s572_s19  ;;  %p576_p9 = scmp.lt.u32.totalorder %s572_s19, %s773_s0 }
  0x17   :  { %p578_p10 = pnand %p576_p9, %p573_p8 }
  0x19   :  { %581 = shalt.err (!%p578_p10)
}
  0x1a   :  { %s582_s24 = scalar_lea.vmem %s690_s27, 256  ;;  %p587_p12 = scmp.lt.s32.totalorder %s690_s27, %s690_s27 }
  0x1b   :  { %p583_p11 = scmp.ne.s32.totalorder %s690_s27, %s582_s24  ;;  %p588_p13 = scmp.lt.s32.totalorder %s582_s24, %s582_s24 }
  0x1d   :  { %p589_p0 = por %p588_p13, %p587_p12 }
  0x1f   :  { %p590_p1 = pnand %p589_p0, %p583_p11 }
  0x21   :  { %593 = shalt.err (!%p590_p1)
}
  0x22   :  { %26 = dma.hbm_to_vmem [thread:$0]  %s773_s0, 256, %s690_s27, [#allocation4], %s646_s13, %s646_s13, %s647_s14  }
  0x23   :  { %s648_s26 = smov [#allocation8]   ;;  %s594_s8 = scalar_lea.hbm %s776_s3, 2048 }
  0x24   :  { %s46_s28 = sshll.u32 %s648_s26, 4  ;;  %p595_p2 = scmp.ne.s32.totalorder %s776_s3, %s594_s8  ;;  %s47_s28 = int_to_ptr.vmem [resolvable:$true] %s46_s28 }
  0x25   :  { %p598_p3 = scmp.lt.u32.totalorder %s594_s8, %s776_s3 }
  0x27   :  { %p600_p4 = pnand %p598_p3, %p595_p2 }
  0x29   :  { %603 = shalt.err (!%p600_p4)
}
  0x2a   :  { %s604_s15 = scalar_lea.vmem %s47_s28, 2048  ;;  %p609_p6 = scmp.lt.s32.totalorder %s47_s28, %s47_s28 }
  0x2b   :  { %p605_p5 = scmp.ne.s32.totalorder %s47_s28, %s604_s15  ;;  %p610_p7 = scmp.lt.s32.totalorder %s604_s15, %s604_s15 }
  0x2d   :  { %p611_p8 = por %p610_p7, %p609_p6 }
  0x2f   :  { %p612_p9 = pnand %p611_p8, %p605_p5 }
  0x31   :  { %615 = shalt.err (!%p612_p9)
}
  0x32   :  { %52 = dma.hbm_to_vmem [thread:$0]  %s776_s3, 2048, %s47_s28, [#allocation7], %s646_s13, %s646_s13, %s647_s14  }
  0x33   :  { %638 = dma.done.wait [#allocation4], 256  }
  0x34   :  { %639 = vsyncadd [#allocation4], 4294967040 }
  0x35   :  { %640 = dma.done.wait [#allocation7], 4096  }
  0x36   :  { %641 = vsyncadd [#allocation7], 4294963200  ;;  %v76_v0 = vld [vmem:[#allocation6] sm:$0xff]  ;;  %v77_v1 = vld [vmem:[#allocation6 + $0x8] sm:$0xff]  ;;  %s649_s21 = smov [#allocation9]  }
  0x37   :  { %v78_v2 = vld [vmem:[#allocation6 + $0x10] sm:$0xff]  ;;  %v472_v3 = vpack.c.bf16 %v77_v1, %v76_v0  ;;  %v79_v4 = vld [vmem:[#allocation6 + $0x18] sm:$0xff]  ;;  %v80_v6 = vld [vmem:[#allocation6 + $0x20] sm:$0xff]  ;;  %v295_v1 = vlaneseq  ;;  %s349_s22 = sshll.u32 %s649_s21, 4  ;;  %s350_s22 = int_to_ptr.vmem [resolvable:$true] %s349_s22 }
  0x38   :  { %v476_v5 = vpack.c.bf16 %v79_v4, %v78_v2  ;;  %v81_v7 = vld [vmem:[#allocation6 + $0x28] sm:$0xff]  ;;  %v82_v9 = vld [vmem:[#allocation6 + $0x30] sm:$0xff]  ;;  %v83_v10 = vld [vmem:[#allocation6 + $0x38] sm:$0xff]  ;;  %s616_s23 = scalar_lea.vmem %s350_s22, 256  ;;  %p621_p11 = scmp.lt.s32.totalorder %s350_s22, %s350_s22 }
  0x39   :  { %473 = vmatprep.subr.bf16.mxu0 %v472_v3  ;;  %v480_v8 = vpack.c.bf16 %v81_v7, %v80_v6  ;;  %v74_v11 = vld [vmem:[#allocation3] sm:$0xff]  ;;  %v186_v12 = vld [vmem:[#allocation8] sm:$0xff]  ;;  %v187_v13 = vld [vmem:[#allocation8 + $0x8] sm:$0xff]  ;;  %v484_v20 = vpack.c.bf16 %v83_v10, %v82_v9  ;;  %v296_v2 = vand.u32 127, %v295_v1  ;;  %p617_p10 = scmp.ne.s32.totalorder %s350_s22, %s616_s23  ;;  %p622_p12 = scmp.lt.s32.totalorder %s616_s23, %s616_s23 }
  0x3a   :  { %475 = vmatpush3.bf16.msra.mxu0 %v472_v3  ;;  %434 = vmatprep.mubr.f32.mxu0 %v74_v11  ;;  %v188_v14 = vld [vmem:[#allocation8 + $0x10] sm:$0xff]  ;;  %v504_v15 = vpack.c.bf16 %v187_v13, %v186_v12  ;;  %v189_v16 = vld [vmem:[#allocation8 + $0x18] sm:$0xff]  ;;  %v190_v18 = vld [vmem:[#allocation8 + $0x20] sm:$0xff] }
  0x3b   :  { %477 = vmatprep.subr.bf16.mxu0 %v476_v5  ;;  %v508_v17 = vpack.c.bf16 %v189_v16, %v188_v14  ;;  %v191_v19 = vld [vmem:[#allocation8 + $0x28] sm:$0xff]  ;;  %v84_v21 = vld [vmem:[#allocation6 + $0x40] sm:$0xff]  ;;  %v86_v25 = vld [vmem:[#allocation6 + $0x50] sm:$0xff]  ;;  %vm297_vm0 = vcmp.lt.s32.totalorder %v296_v2, 32  ;;  %p623_p13 = por %p622_p12, %p621_p11 }
  0x3c   :  { %505 = vmatprep.subr.bf16.mxu1 %v504_v15  ;;  %v85_v22 = vld [vmem:[#allocation6 + $0x48] sm:$0xff]  ;;  %v512_v23 = vpack.c.bf16 %v191_v19, %v190_v18  ;;  %v87_v26 = vld [vmem:[#allocation6 + $0x58] sm:$0xff]  ;;  %v88_v28 = vld [vmem:[#allocation6 + $0x60] sm:$0xff] }
  0x3d   :  { %507 = vmatpush3.bf16.msra.mxu1 %v504_v15  ;;  %v488_v24 = vpack.c.bf16 %v85_v22, %v84_v21  ;;  %v492_v27 = vpack.c.bf16 %v87_v26, %v86_v25  ;;  %v89_v29 = vld [vmem:[#allocation6 + $0x68] sm:$0xff]  ;;  %v90_v31 = vld [vmem:[#allocation6 + $0x70] sm:$0xff]  ;;  %v91_v32 = vld [vmem:[#allocation6 + $0x78] sm:$0xff]  ;;  %p624_p0 = pnand %p623_p13, %p617_p10 }
  0x3e   :  { %479 = vmatpush3.bf16.msra.mxu0 %v476_v5  ;;  %509 = vmatprep.subr.bf16.mxu1 %v508_v17  ;;  %v496_v30 = vpack.c.bf16 %v89_v29, %v88_v28  ;;  %v500_v33 = vpack.c.bf16 %v91_v32, %v90_v31  ;;  %v75_v34 = vld [vmem:[#allocation3 + $0x8] sm:$0xff]  ;;  %v192_v35 = vld [vmem:[#allocation8 + $0x30] sm:$0xff]  ;;  %v194_v38 = vld [vmem:[#allocation8 + $0x40] sm:$0xff] }
  0x3f   :  { %481 = vmatprep.subr.bf16.mxu0 %v480_v8  ;;  %v193_v36 = vld [vmem:[#allocation8 + $0x38] sm:$0xff]  ;;  %v195_v39 = vld [vmem:[#allocation8 + $0x48] sm:$0xff]  ;;  %v196_v41 = vld [vmem:[#allocation8 + $0x50] sm:$0xff] }
  0x40   :  { %v516_v37 = vpack.c.bf16 %v193_v36, %v192_v35  ;;  %v520_v40 = vpack.c.bf16 %v195_v39, %v194_v38  ;;  %v197_v42 = vld [vmem:[#allocation8 + $0x58] sm:$0xff]  ;;  %v198_v44 = vld [vmem:[#allocation8 + $0x60] sm:$0xff]  ;;  %v199_v45 = vld [vmem:[#allocation8 + $0x68] sm:$0xff] }
  0x41   :  { %511 = vmatpush3.bf16.msra.mxu1 %v508_v17  ;;  %v524_v43 = vpack.c.bf16 %v197_v42, %v196_v41  ;;  %v528_v46 = vpack.c.bf16 %v199_v45, %v198_v44  ;;  %v200_v47 = vld [vmem:[#allocation8 + $0x70] sm:$0xff]  ;;  %v201_v48 = vld [vmem:[#allocation8 + $0x78] sm:$0xff] }
  0x42   :  { %483 = vmatpush3.bf16.msra.mxu0 %v480_v8  ;;  %513 = vmatprep.subr.bf16.mxu1 %v512_v23  ;;  %v532_v49 = vpack.c.bf16 %v201_v48, %v200_v47  ;;  %v362_v50 = vld [vmem:[%s775_s2] ss:$0 sm:$0xff] }
  0x43   :  { %485 = vmatprep.subr.bf16.mxu0 %v484_v20  ;;  %v363_v3 = vld [vmem:[%s777_s4] ss:$0 sm:$0xff] }
  0x44   :  { %v365_v29 = vld [vmem:[%s779_s6] ss:$0 sm:$0xff] }
  0x45   :  { %515 = vmatpush3.bf16.msra.mxu1 %v512_v23 }
  0x46   :  { %487 = vmatpush3.bf16.msra.mxu0 %v484_v20  ;;  %517 = vmatprep.subr.bf16.mxu1 %v516_v37 }
  0x47   :  { %489 = vmatprep.subr.bf16.mxu0 %v488_v24 }
  0x49   :  { %519 = vmatpush3.bf16.msra.mxu1 %v516_v37 }
  0x4a   :  { %491 = vmatpush3.bf16.msra.mxu0 %v488_v24  ;;  %521 = vmatprep.subr.bf16.mxu1 %v520_v40 }
  0x4b   :  { %493 = vmatprep.subr.bf16.mxu0 %v492_v27 }
  0x4d   :  { %523 = vmatpush3.bf16.msra.mxu1 %v520_v40 }
  0x4e   :  { %495 = vmatpush3.bf16.msra.mxu0 %v492_v27  ;;  %525 = vmatprep.subr.bf16.mxu1 %v524_v43  ;;  %v364_v27 = vld [vmem:[%s778_s5] ss:$0 sm:$0xff] }
  0x4f   :  { %497 = vmatprep.subr.bf16.mxu0 %v496_v30 }
  0x51   :  { %527 = vmatpush3.bf16.msra.mxu1 %v524_v43 }
  0x52   :  { %499 = vmatpush3.bf16.msra.mxu0 %v496_v30  ;;  %529 = vmatprep.subr.bf16.mxu1 %v528_v46 }
  0x53   :  { %501 = vmatprep.subr.bf16.mxu0 %v500_v33 }
  0x55   :  { %531 = vmatpush3.bf16.msra.mxu1 %v528_v46 }
  0x56   :  { %503 = vmatpush3.bf16.msra.mxu0 %v500_v33  ;;  %533 = vmatprep.subr.bf16.mxu1 %v532_v49 }
  0x59   :  { %435 = vmatmul.mubr.f32.vlgmr.msra.gmra.mrb[0].mxu0 %v75_v34  ;;  %535 = vmatpush3.bf16.msra.mxu1 %v532_v49 }
 0x12c   :  { %v436_v51 = vpop.f32.mrb[0].mxu0 }
 0x12d   :  { %v171_v52 = vadd.f32 %v436_v51, %v362_v50  ;;  %v165_v53 = vpop.f32.mrb[1].mxu0 }
 0x12e   :  { %v166_v54 = vadd.f32 %v362_v50, %v165_v53 }
 0x12f   :  { %v177_v55 = vmul.f32 0.70710677, %v171_v52  ;;  %v175_v62 = vmul.f32 0.5, %v171_v52 }
 0x130   :  { %v176_v56 = vmul.f32 0.70710677, %v166_v54  ;;  %v174_v60 = vmul.f32 0.5, %v166_v54 }
 0x131   :  { %542 = verf.f32 %v177_v55 }
 0x132   :  { %544 = verf.f32 %v176_v56 }
 0x13b   :  { %v543_v57 = vpop.eup %542 }
 0x13c   :  { %v545_v58 = vpop.eup %544  ;;  %v181_v59 = vadd.f32 1.0, %v543_v57 }
 0x13d   :  { %v180_v61 = vadd.f32 1.0, %v545_v58 }
 0x13e   :  { %v183_v0 = vmul.f32 %v181_v59, %v175_v62 }
 0x13f   :  { %v182_v63 = vmul.f32 %v180_v61, %v174_v60 }
 0x141   :  { %469 = vmatprep.mubr.f32.mxu1 %v182_v63 }
 0x142   :  { %470 = vmatmul.mubr.f32.vlgmr.msra.gmra.mrb[0].mxu1 %v183_v0 }
 0x215   :  { %v471_v4 = vpop.f32.mrb[0].mxu1 }
 0x216   :  { %v268_v5 = vpop.f32.mrb[1].mxu1  ;;  %v294_v7 = vadd.f32 %v471_v4, %v363_v3 }
 0x217   :  { %v293_v6 = vadd.f32 %v363_v3, %v268_v5 }
 0x218   :  { %v299_v9 = vsel %vm297_vm0, %v294_v7, 0.0 }
 0x219   :  { %v298_v8 = vsel %vm297_vm0, %v293_v6, 0.0 }
 0x21a   :  { %300 = vadd.xlane.f32.xlu0 %v298_v8 }
 0x21e   :  { %302 = vadd.xlane.f32.xlu0 %v299_v9 }
 0x2a7   :  { %v301_v10 = vpop.xlane.xlu0 %300 }
 0x2a8   :  { %v304_v11 = vmul.f32 0.03125, %v301_v10 }
 0x2aa   :  { %v306_v12 = vsub.f32 %v293_v6, %v304_v11 }
 0x2ab   :  { %v303_v13 = vpop.xlane.xlu0 %302 }
 0x2ac   :  { %v305_v14 = vmul.f32 0.03125, %v303_v13  ;;  %v308_v15 = vsel %vm297_vm0, %v306_v12, 0.0 }
 0x2ad   :  { %v310_v16 = vmul.f32 %v308_v15, %v308_v15 }
 0x2ae   :  { %v307_v17 = vsub.f32 %v294_v7, %v305_v14 }
 0x2af   :  { %312 = vadd.xlane.f32.xlu1 %v310_v16 }
 0x2b0   :  { %v309_v18 = vsel %vm297_vm0, %v307_v17, 0.0 }
 0x2b1   :  { %v311_v19 = vmul.f32 %v309_v18, %v309_v18 }
 0x2b3   :  { %314 = vadd.xlane.f32.xlu1 %v311_v19 }
 0x33c   :  { %v313_v20 = vpop.xlane.xlu1 %312 }
 0x33d   :  { %v316_v21 = vmul.f32 0.03125, %v313_v20 }
 0x33f   :  { %v318_v22 = vadd.f32 1e-06, %v316_v21 }
 0x340   :  { %v315_v23 = vpop.xlane.xlu1 %314 }
 0x341   :  { %546 = vrsqrt.f32 %v318_v22  ;;  %v317_v24 = vmul.f32 0.03125, %v315_v23 }
 0x343   :  { %v319_v25 = vadd.f32 1e-06, %v317_v24 }
 0x345   :  { %548 = vrsqrt.f32 %v319_v25 }
 0x34b   :  { %v547_v26 = vpop.eup %546 }
 0x34c   :  { %v322_v28 = vmul.f32 %v547_v26, %v306_v12 }
 0x34e   :  { %v331_v30 = vmul.f32 %v364_v27, %v322_v28 }
 0x34f   :  { %v549_v31 = vpop.eup %548 }
 0x350   :  { %v323_v32 = vmul.f32 %v549_v31, %v307_v17  ;;  %v340_v33 = vadd.f32 %v365_v29, %v331_v30 }
 0x352   :  { %v332_v34 = vmul.f32 %v364_v27, %v323_v32  ;;  %342 = vst [vmem:[#allocation9] sm:$0xff] %v340_v33 }
 0x354   :  { %v341_v35 = vadd.f32 %v365_v29, %v332_v34 }
 0x356   :  { %343 = vst [vmem:[#allocation9 + $0x8] sm:$0xff] %v341_v35 }
 0x357   :  { %627 = shalt.err (!%p624_p0)
}
 0x358   :  { %s628_s24 = scalar_lea.hbm %s780_s7, 256 }
 0x359   :  { %p629_p1 = scmp.ne.s32.totalorder %s780_s7, %s628_s24  ;;  %p632_p2 = scmp.lt.u32.totalorder %s628_s24, %s780_s7 }
 0x35b   :  { %p634_p3 = pnand %p632_p2, %p629_p1 }
 0x35d   :  { %637 = shalt.err (!%p634_p3)
}
 0x35e   :  { %355 = dma.vmem_to_hbm [thread:$0]  %s350_s22, 256, %s780_s7, [#allocation5], %s646_s13, %s646_s13, %s647_s14  }
 0x35f   :  { %642 = dma.done.wait [#allocation5], 256  }
 0x360   :  { %643 = vsyncadd [#allocation5], 4294967040 }
 0x361   :  { %359 = vsyncpa [#allocation4], 1 }
 0x362   :  { %360 = vsyncpa [#allocation7], 1 }
 0x363   :  { %361 = vsyncpa [#allocation5], 1 }

</bundles_post_ra>
